<compile_context>
chip_gen: v7x
topology: tpu7x:2x2x1
jax: 0.10.0
libtpu: 0.0.40
codegen_flags: <defaults>
</compile_context>

<pallas_src>
import math

import jax
import jax.numpy as jnp
from jax.experimental import pallas as pl
from jax.experimental.pallas import tpu as pltpu


def _round_up(x, m):
    return ((x + m - 1) // m) * m


def _vmem_capacity_bytes():
    try:
        return int(pltpu.get_tpu_info().vmem_capacity_bytes)
    except Exception:
        try:
            kind = jax.devices()[0].device_kind.lower()
        except Exception:
            kind = ""
        return (64 << 20) if ("v7" in kind or "7x" in kind) else (128 << 20)


# ----------------------------------------------------------------------------
# Path A: all weights resident in VMEM (single-buffered), one grid step per
# batch tile, statically unrolled layer loop.  Biases are one fused vector.
# ----------------------------------------------------------------------------
def _make_resident_kernel(num_layers, bias_offsets, bias_sizes):
    def kernel(*refs):
        x_ref, bias_ref = refs[0], refs[1]      # f32 (bt, nin), f32 (1, total)
        o_ref = refs[-1]                        # f32 (bt, n_last_pad)
        h = x_ref[...].astype(jnp.bfloat16)     # in-kernel cast (no wrapper pass)
        for i in range(num_layers):
            w = refs[2 + i][...]                # bf16 (K_i, N_pad_i)
            off, sz = bias_offsets[i], bias_sizes[i]
            b = bias_ref[:, off:off + sz]
            h = jnp.dot(h, w, preferred_element_type=jnp.float32) + b
            if i < num_layers - 1:              # ReLU on all but Denseout
                h = jnp.maximum(h, 0.0).astype(jnp.bfloat16)
        o_ref[...] = h
    return kernel


# ----------------------------------------------------------------------------
# Path B: layer-streaming fallback with N-tiled weights, ping-pong activation
# scratch, and scalar-prefetched per-layer valid-tile counts (zero-tile skip).
# ----------------------------------------------------------------------------
def _make_streamed_kernel(num_layers, nin, tn):
    last = num_layers - 1

    def kernel(nvt_ref, x_ref, w_ref, b_ref, o_ref, act_ref):
        l = pl.program_id(1)
        n = pl.program_id(2)

        @pl.when(jnp.logical_and(l == 0, n == 0))
        def _():
            # Fresh batch tile: zero both activation slots, load x into slot 1
            # (layer 0 reads slot (0+1)%2 == 1).
            act_ref[...] = jnp.zeros_like(act_ref)
            act_ref[1, :, :nin] = x_ref[...].astype(jnp.bfloat16)

        @pl.when(n < nvt_ref[l])                # skip all-zero weight tiles
        def _():
            a = act_ref[(l + 1) % 2]            # (bt, d_pad) bf16, dynamic slot
            h = jnp.dot(a, w_ref[...],
                        preferred_element_type=jnp.float32) + b_ref[...]
            o_ref[...] = h                      # only the last layer's value survives
            relu_h = jnp.maximum(h, 0.0).astype(jnp.bfloat16)
            col = pl.multiple_of(n * tn, tn)

            @pl.when(jnp.logical_and(l != last, l % 2 == 0))
            def _():
                act_ref[0, :, pl.ds(col, tn)] = relu_h

            @pl.when(jnp.logical_and(l != last, l % 2 == 1))
            def _():
                act_ref[1, :, pl.ds(col, tn)] = relu_h

    return kernel


# ----------------------------------------------------------------------------
# Wrapper
# ----------------------------------------------------------------------------
def pyramid_mlp_pallas(x, weights, biases, *, force_streamed=False):
    """Pyramid MLP forward:  relu(linear) x (L-1)  ->  linear.

    x:        (B, nin) float32
    weights:  list of (in_i, out_i) float32 (transposed vs. torch Linear)
    biases:   list of (out_i,) float32
    """
    B, nin = x.shape
    L = len(weights)
    dims = [nin] + [int(w.shape[1]) for w in weights]
    assert all(int(w.shape[0]) == dims[i] for i, w in enumerate(weights))
    nout = dims[-1]

    pads = [_round_up(max(d, 128), 128) for d in dims]   # per-dim lane padding
    max_pad = max(pads)

    cap = _vmem_capacity_bytes()
    two_tc = cap <= (96 << 20)                 # v7x-like: 64 MiB/TC, 2 TCs/chip
    resident_budget = int(0.75 * cap)          # ~48 MiB on v7x, ~96 MiB v5e/v6e
    vmem_limit = max(32 << 20, int(0.85 * cap))

    # Resident-path footprint: single-buffered bf16 weights + fused bias +
    # double-buffered x/out tiles + live in-kernel intermediates.
    w_elems = [(dims[0] if i == 0 else pads[i]) * pads[i + 1] for i in range(L)]
    bias_total = sum(pads[1:])

    def resident_bytes(bt):
        return (2 * bt * _round_up(nin, 128) * 4
                + 2 * bt * pads[-1] * 4
                + 2 * sum(w_elems)
                + bias_total * 4
                + 2 * bt * max_pad * 6
                + (2 << 20))

    # Batch-tile candidates: big tiles amortize grid overhead / fill MXU M,
    # but keep >=2 tiles on v7x so both TensorCores get work.
    if B < 128:
        cands = [_round_up(max(B, 8), 8)]
    else:
        cands = [c for c in (512, 256, 128) if c <= _round_up(B, 8)] or [128]
        if two_tc and B >= 256:
            cands = [c for c in cands if _round_up(B, c) // c >= 2] or [128]

    b_tile = next((c for c in cands if resident_bytes(c) <= resident_budget),
                  None)
    use_resident = (not force_streamed) and (b_tile is not None)

    if use_resident:
        b_pad = _round_up(B, b_tile)
        nb = b_pad // b_tile
        x_in = x if b_pad == B else jnp.pad(x, ((0, b_pad - B), (0, 0)))

        # Per-layer bf16 weights: layer 0 keeps true K=nin; others pad K to the
        # previous layer's padded width; all pad N to a lane multiple.
        w_pads = []
        for i, w in enumerate(weights):
            kp = dims[0] if i == 0 else pads[i]
            np_ = pads[i + 1]
            w_pads.append(jnp.pad(w.astype(jnp.bfloat16),
                                  ((0, kp - w.shape[0]), (0, np_ - w.shape[1]))))

        # Single fused bias vector; each segment lane-padded so slices align.
        bias_cat = jnp.concatenate(
            [jnp.pad(b.astype(jnp.float32), (0, pads[i + 1] - b.shape[0]))
             for i, b in enumerate(biases)]).reshape(1, bias_total)
        bias_offs, off = [], 0
        for i in range(L):
            bias_offs.append(off)
            off += pads[i + 1]

        kernel = _make_resident_kernel(L, bias_offs,
                                       [pads[i + 1] for i in range(L)])

        def run(single_buffer):
            def const_spec(shape):
                if single_buffer:
                    return pl.BlockSpec(shape, lambda i: (0, 0),
                                        pipeline_mode=pl.Buffered(1))
                return pl.BlockSpec(shape, lambda i: (0, 0))

            in_specs = [pl.BlockSpec((b_tile, nin), lambda i: (i, 0)),
                        const_spec((1, bias_total))]
            in_specs += [const_spec(tuple(int(s) for s in wp.shape))
                         for wp in w_pads]
            return pl.pallas_call(
                kernel,
                out_shape=jax.ShapeDtypeStruct((b_pad, pads[-1]), jnp.float32),
                grid=(nb,),
                in_specs=in_specs,
                out_specs=pl.BlockSpec((b_tile, pads[-1]), lambda i: (i, 0)),
                compiler_params=pltpu.CompilerParams(
                    dimension_semantics=("parallel",),
                    vmem_limit_bytes=vmem_limit),
            )(x_in, bias_cat, *w_pads)

        try:
            out_pad = run(single_buffer=True)
        except Exception:
            # TODO(synk): drop this fallback once pl.Buffered(1) single-buffered
            # grid-invariant operands are guaranteed by the deployed jax.
            out_pad = run(single_buffer=False)

        if b_pad == B and pads[-1] == nout:
            return out_pad
        return out_pad[:B, :nout]

    # ------------------------- streamed fallback -----------------------------
    if B < 256:
        b_tile_s = _round_up(max(B, 8), 8)
    elif two_tc and B < 512:
        b_tile_s = 128
    else:
        b_tile_s = 256

    tn = d_pad = None
    bt_cands = []
    for c in (b_tile_s, b_tile_s // 2, b_tile_s // 4):
        c = max(_round_up(max(c, 8), 8), 8)
        if c not in bt_cands:
            bt_cands.append(c)
    for bt_c in bt_cands:
        for tn_c in (512, 256, 128):
            tn_c = min(tn_c, max_pad)
            d_c = _round_up(max_pad, tn_c)
            need = (2 * bt_c * _round_up(nin, 128) * 4   # x tile (f32 x2)
                    + 2 * d_c * tn_c * 2                 # weight tile (bf16 x2)
                    + 2 * 8 * tn_c * 4                   # bias tile
                    + 2 * bt_c * tn_c * 4                # out tile (f32 x2)
                    + 2 * bt_c * d_c * 2                 # ping-pong activation
                    + bt_c * tn_c * 8 + (2 << 20))
            if need <= vmem_limit:
                b_tile_s, tn, d_pad = bt_c, tn_c, d_c
                break
        if tn is not None:
            break
    if tn is None:
        # TODO(synk): add K-dim weight tiling for pyramids whose (d_pad, 128)
        # weight column slab still overflows VMEM; use smallest tiles meanwhile.
        b_tile_s, tn = 8, 128
        d_pad = _round_up(max_pad, tn)

    b_pad_s = _round_up(B, b_tile_s)
    nb_s = b_pad_s // b_tile_s
    nt = d_pad // tn
    nt_last = pl.cdiv(pads[-1], tn)
    x_in = x if b_pad_s == B else jnp.pad(x, ((0, b_pad_s - B), (0, 0)))

    # TODO(synk): replace the (L, d_pad, d_pad) zero-padded weight slab with a
    # flat concatenated buffer + scalar-prefetched offsets (also skips K-side
    # zero padding in HBM for very deep / very uneven pyramids).
    w_stack = jnp.stack([
        jnp.pad(w.astype(jnp.bfloat16),
                ((0, d_pad - w.shape[0]), (0, d_pad - w.shape[1])))
        for w in weights])
    b_stack = jnp.stack([
        jnp.pad(b.astype(jnp.float32), (0, d_pad - b.shape[0])).reshape(1, d_pad)
        for b in biases])
    nvt = jnp.array([pl.cdiv(pads[i + 1], tn) for i in range(L)],
                    dtype=jnp.int32)

    def _clamp(l, n, v):
        return jnp.minimum(n, v[l] - 1)

    grid_spec = pltpu.PrefetchScalarGridSpec(
        num_scalar_prefetch=1,
        grid=(nb_s, L, nt),
        in_specs=[
            pl.BlockSpec((b_tile_s, nin), lambda i, l, n, v: (i, 0)),
            pl.BlockSpec((None, d_pad, tn),
                         lambda i, l, n, v: (l, 0, _clamp(l, n, v))),
            pl.BlockSpec((None, 1, tn),
                         lambda i, l, n, v: (l, 0, _clamp(l, n, v))),
        ],
        out_specs=pl.BlockSpec(
            (b_tile_s, tn),
            lambda i, l, n, v: (i, jnp.minimum(n, nt_last - 1))),
        scratch_shapes=[pltpu.VMEM((2, b_tile_s, d_pad), jnp.bfloat16)],
    )

    out_pad = pl.pallas_call(
        _make_streamed_kernel(L, nin, tn),
        out_shape=jax.ShapeDtypeStruct((b_pad_s, nt_last * tn), jnp.float32),
        grid_spec=grid_spec,
        compiler_params=pltpu.CompilerParams(
            dimension_semantics=("parallel", "arbitrary", "arbitrary"),
            vmem_limit_bytes=vmem_limit),
    )(nvt, x_in, w_stack, b_stack)

    return out_pad[:B, :nout]


# ----------------------------------------------------------------------------
# Parameter construction mirroring AMLDNNPyramid.__init__
# ----------------------------------------------------------------------------
def make_pyramid_params(key, nin, nout, num_layers, initial_size):
    nodes = []
    for i in range(num_layers + 1):
        nodes.append(int(-(initial_size - nout) / (num_layers + 1) * i
                         + initial_size))
    io = [(nin, initial_size)]
    io += [(nodes[i], nodes[i + 1]) for i in range(num_layers)]
    io += [(nodes[-1], nout)]

    weights, biases = [], []
    for (din, dout) in io:
        key, kw, kb = jax.random.split(key, 3)
        bound = 1.0 / math.sqrt(float(din))   # PyTorch Linear default init
        weights.append(jax.random.uniform(kw, (din, dout), jnp.float32,
                                          -bound, bound))
        biases.append(jax.random.uniform(kb, (dout,), jnp.float32,
                                         -bound, bound))
    return weights, biases


def pyramid_mlp_reference(x, weights, biases):
    # Same math as the kernels: bf16 operands, f32 MXU accumulation, f32 bias.
    h = x.astype(jnp.bfloat16)
    n = len(weights)
    for i, (w, b) in enumerate(zip(weights, biases)):
        h = jnp.dot(h, w.astype(jnp.bfloat16),
                    preferred_element_type=jnp.float32) + b
        if i < n - 1:
            h = jnp.maximum(h, 0.0).astype(jnp.bfloat16)
    return h


if __name__ == "__main__":
    key = jax.random.PRNGKey(0)

    def check(B, nin, nout, num_layers, initial_size, key):
        key, kx, kp = jax.random.split(key, 3)
        x = jax.random.normal(kx, (B, nin), jnp.float32)
        weights, biases = make_pyramid_params(kp, nin, nout, num_layers,
                                              initial_size)
        ref = pyramid_mlp_reference(x, weights, biases)

        out = jax.block_until_ready(pyramid_mlp_pallas(x, weights, biases))
        assert out.shape == (B, nout), out.shape
        assert jnp.allclose(out, ref, atol=2e-3, rtol=2e-3), (
            float(jnp.max(jnp.abs(out - ref))))

        out_s = jax.block_until_ready(
            pyramid_mlp_pallas(x, weights, biases, force_streamed=True))
        assert out_s.shape == (B, nout), out_s.shape
        assert jnp.allclose(out_s, ref, atol=2e-3, rtol=2e-3), (
            float(jnp.max(jnp.abs(out_s - ref))))
        return key

    # Small module-consistent shapes (exercises both paths).
    key = check(B=2, nin=16, nout=8, num_layers=2, initial_size=32, key=key)
    # Wider pyramid: exercises multi-tile streamed path (clamped/skipped tiles).
    key = check(B=10, nin=16, nout=8, num_layers=2, initial_size=600, key=key)

    print("KERNEL_OK")
</pallas_src>

<mosaic_0001>
module attributes {stable_mosaic.version = 11 : i64} {
  func.func @kernel(%arg0: i32, %arg1: memref<8x16xf32, #tpu.memory_space<vmem>>, %arg2: memref<1x512xf32, #tpu.memory_space<vmem>>, %arg3: memref<16x128xbf16, #tpu.memory_space<vmem>>, %arg4: memref<128x128xbf16, #tpu.memory_space<vmem>>, %arg5: memref<128x128xbf16, #tpu.memory_space<vmem>>, %arg6: memref<128x128xbf16, #tpu.memory_space<vmem>>, %arg7: memref<8x128xf32, #tpu.memory_space<vmem>>) attributes {dimension_semantics = [#tpu.dimension_semantics<parallel>], iteration_bounds = array<i64: 1>, scalar_prefetch = 0 : i64, scratch_operands = 0 : i64, tpu.core_type = #tpu.core_type<tc>, window_params = [{transform_indices = @transform_0, window_bounds = array<i64: 8, 16>}, {pipeline_mode = #tpu.pipeline_mode<synchronous>, transform_indices = @transform_1, window_bounds = array<i64: 1, 512>}, {pipeline_mode = #tpu.pipeline_mode<synchronous>, transform_indices = @transform_2, window_bounds = array<i64: 16, 128>}, {pipeline_mode = #tpu.pipeline_mode<synchronous>, transform_indices = @transform_3, window_bounds = array<i64: 128, 128>}, {pipeline_mode = #tpu.pipeline_mode<synchronous>, transform_indices = @transform_4, window_bounds = array<i64: 128, 128>}, {pipeline_mode = #tpu.pipeline_mode<synchronous>, transform_indices = @transform_5, window_bounds = array<i64: 128, 128>}, {transform_indices = @transform_6, window_bounds = array<i64: 8, 128>}]} {
    %c0 = arith.constant 0 : index
    %c0_0 = arith.constant 0 : index
    %0 = vector.load %arg1[%c0, %c0_0] : memref<8x16xf32, #tpu.memory_space<vmem>>, vector<8x16xf32>
    %1 = arith.truncf %0 : vector<8x16xf32> to vector<8x16xbf16>
    %c0_1 = arith.constant 0 : index
    %c0_2 = arith.constant 0 : index
    %2 = vector.load %arg3[%c0_1, %c0_2] : memref<16x128xbf16, #tpu.memory_space<vmem>>, vector<16x128xbf16>
    %c0_3 = arith.constant 0 : index
    %c0_4 = arith.constant 0 : index
    %3 = vector.load %arg2[%c0_3, %c0_4] : memref<1x512xf32, #tpu.memory_space<vmem>>, vector<1x128xf32>
    %cst = arith.constant dense<0.000000e+00> : vector<8x128xf32>
    %4 = tpu.matmul %1, %2, %cst {dimension_numbers = #tpu.dot_dimension_numbers<[1], [0], [0], [1], [0, 0, 1, 1], [], []>} : vector<8x16xbf16>, vector<16x128xbf16>, vector<8x128xf32> -> vector<8x128xf32>
    %5 = vector.broadcast %3 : vector<1x128xf32> to vector<8x128xf32>
    %6 = arith.addf %4, %5 : vector<8x128xf32>
    %cst_5 = arith.constant 0.000000e+00 : f32
    %7 = vector.broadcast %cst_5 : f32 to vector<8x128xf32>
    %8 = arith.maximumf %6, %7 : vector<8x128xf32>
    %9 = arith.truncf %8 : vector<8x128xf32> to vector<8x128xbf16>
    %c0_6 = arith.constant 0 : index
    %c0_7 = arith.constant 0 : index
    %10 = vector.load %arg4[%c0_6, %c0_7] : memref<128x128xbf16, #tpu.memory_space<vmem>>, vector<128x128xbf16>
    %c0_8 = arith.constant 0 : index
    %c128 = arith.constant 128 : index
    %11 = vector.load %arg2[%c0_8, %c128] : memref<1x512xf32, #tpu.memory_space<vmem>>, vector<1x128xf32>
    %cst_9 = arith.constant dense<0.000000e+00> : vector<8x128xf32>
    %12 = tpu.matmul %9, %10, %cst_9 {dimension_numbers = #tpu.dot_dimension_numbers<[1], [0], [0], [1], [0, 0, 1, 1], [], []>} : vector<8x128xbf16>, vector<128x128xbf16>, vector<8x128xf32> -> vector<8x128xf32>
    %13 = vector.broadcast %11 : vector<1x128xf32> to vector<8x128xf32>
    %14 = arith.addf %12, %13 : vector<8x128xf32>
    %cst_10 = arith.constant 0.000000e+00 : f32
    %15 = vector.broadcast %cst_10 : f32 to vector<8x128xf32>
    %16 = arith.maximumf %14, %15 : vector<8x128xf32>
    %17 = arith.truncf %16 : vector<8x128xf32> to vector<8x128xbf16>
    %c0_11 = arith.constant 0 : index
    %c0_12 = arith.constant 0 : index
    %18 = vector.load %arg5[%c0_11, %c0_12] : memref<128x128xbf16, #tpu.memory_space<vmem>>, vector<128x128xbf16>
    %c0_13 = arith.constant 0 : index
    %c256 = arith.constant 256 : index
    %19 = vector.load %arg2[%c0_13, %c256] : memref<1x512xf32, #tpu.memory_space<vmem>>, vector<1x128xf32>
    %cst_14 = arith.constant dense<0.000000e+00> : vector<8x128xf32>
    %20 = tpu.matmul %17, %18, %cst_14 {dimension_numbers = #tpu.dot_dimension_numbers<[1], [0], [0], [1], [0, 0, 1, 1], [], []>} : vector<8x128xbf16>, vector<128x128xbf16>, vector<8x128xf32> -> vector<8x128xf32>
    %21 = vector.broadcast %19 : vector<1x128xf32> to vector<8x128xf32>
    %22 = arith.addf %20, %21 : vector<8x128xf32>
    %cst_15 = arith.constant 0.000000e+00 : f32
    %23 = vector.broadcast %cst_15 : f32 to vector<8x128xf32>
    %24 = arith.maximumf %22, %23 : vector<8x128xf32>
    %25 = arith.truncf %24 : vector<8x128xf32> to vector<8x128xbf16>
    %c0_16 = arith.constant 0 : index
    %c0_17 = arith.constant 0 : index
    %26 = vector.load %arg6[%c0_16, %c0_17] : memref<128x128xbf16, #tpu.memory_space<vmem>>, vector<128x128xbf16>
    %c0_18 = arith.constant 0 : index
    %c384 = arith.constant 384 : index
    %27 = vector.load %arg2[%c0_18, %c384] : memref<1x512xf32, #tpu.memory_space<vmem>>, vector<1x128xf32>
    %cst_19 = arith.constant dense<0.000000e+00> : vector<8x128xf32>
    %28 = tpu.matmul %25, %26, %cst_19 {dimension_numbers = #tpu.dot_dimension_numbers<[1], [0], [0], [1], [0, 0, 1, 1], [], []>} : vector<8x128xbf16>, vector<128x128xbf16>, vector<8x128xf32> -> vector<8x128xf32>
    %29 = vector.broadcast %27 : vector<1x128xf32> to vector<8x128xf32>
    %30 = arith.addf %28, %29 : vector<8x128xf32>
    %c0_20 = arith.constant 0 : index
    %c0_21 = arith.constant 0 : index
    %31 = vector.load %arg7[%c0_20, %c0_21] : memref<8x128xf32, #tpu.memory_space<vmem>>, vector<8x128xf32>
    tpu.vector_store %arg7[%c0_20, %c0_21], %30 {strides = array<i32>} : memref<8x128xf32, #tpu.memory_space<vmem>>, vector<8x128xf32>,
    return
  }
  func.func @transform_0(%arg0: i32) -> (i32, i32) {
    %c0_i32 = arith.constant 0 : i32
    %c0_i32_0 = arith.constant 0 : i32
    return %arg0, %c0_i32 : i32, i32
  }
  func.func @transform_1(%arg0: i32) -> (i32, i32) {
    %c0_i32 = arith.constant 0 : i32
    %c0_i32_0 = arith.constant 0 : i32
    %c0_i32_1 = arith.constant 0 : i32
    return %c0_i32, %c0_i32_0 : i32, i32
  }
  func.func @transform_2(%arg0: i32) -> (i32, i32) {
    %c0_i32 = arith.constant 0 : i32
    %c0_i32_0 = arith.constant 0 : i32
    %c0_i32_1 = arith.constant 0 : i32
    return %c0_i32, %c0_i32_0 : i32, i32
  }
  func.func @transform_3(%arg0: i32) -> (i32, i32) {
    %c0_i32 = arith.constant 0 : i32
    %c0_i32_0 = arith.constant 0 : i32
    %c0_i32_1 = arith.constant 0 : i32
    return %c0_i32, %c0_i32_0 : i32, i32
  }
  func.func @transform_4(%arg0: i32) -> (i32, i32) {
    %c0_i32 = arith.constant 0 : i32
    %c0_i32_0 = arith.constant 0 : i32
    %c0_i32_1 = arith.constant 0 : i32
    return %c0_i32, %c0_i32_0 : i32, i32
  }
  func.func @transform_5(%arg0: i32) -> (i32, i32) {
    %c0_i32 = arith.constant 0 : i32
    %c0_i32_0 = arith.constant 0 : i32
    %c0_i32_1 = arith.constant 0 : i32
    return %c0_i32, %c0_i32_0 : i32, i32
  }
  func.func @transform_6(%arg0: i32) -> (i32, i32) {
    %c0_i32 = arith.constant 0 : i32
    %c0_i32_0 = arith.constant 0 : i32
    return %arg0, %c0_i32 : i32, i32
  }
}

module attributes {stable_mosaic.version = 11 : i64} {
  func.func @kernel(%arg0: i32, %arg1: memref<8x16xf32, #tpu.memory_space<vmem>>, %arg2: memref<1x512xf32, #tpu.memory_space<vmem>>, %arg3: memref<16x128xbf16, #tpu.memory_space<vmem>>, %arg4: memref<128x128xbf16, #tpu.memory_space<vmem>>, %arg5: memref<128x128xbf16, #tpu.memory_space<vmem>>, %arg6: memref<128x128xbf16, #tpu.memory_space<vmem>>, %arg7: memref<8x128xf32, #tpu.memory_space<vmem>>) attributes {dimension_semantics = [#tpu.dimension_semantics<parallel>], iteration_bounds = array<i64: 1>, scalar_prefetch = 0 : i64, scratch_operands = 0 : i64, tpu.core_type = #tpu.core_type<tc>, window_params = [{transform_indices = @transform_0, window_bounds = array<i64: 8, 16>}, {pipeline_mode = #tpu.pipeline_mode<synchronous>, transform_indices = @transform_1, window_bounds = array<i64: 1, 512>}, {pipeline_mode = #tpu.pipeline_mode<synchronous>, transform_indices = @transform_2, window_bounds = array<i64: 16, 128>}, {pipeline_mode = #tpu.pipeline_mode<synchronous>, transform_indices = @transform_3, window_bounds = array<i64: 128, 128>}, {pipeline_mode = #tpu.pipeline_mode<synchronous>, transform_indices = @transform_4, window_bounds = array<i64: 128, 128>}, {pipeline_mode = #tpu.pipeline_mode<synchronous>, transform_indices = @transform_5, window_bounds = array<i64: 128, 128>}, {transform_indices = @transform_6, window_bounds = array<i64: 8, 128>}]} {
    %c0 = arith.constant 0 : index
    %c0_0 = arith.constant 0 : index
    %0 = vector.load %arg1[%c0, %c0_0] : memref<8x16xf32, #tpu.memory_space<vmem>>, vector<8x16xf32>
    %1 = arith.truncf %0 : vector<8x16xf32> to vector<8x16xbf16>
    %c0_1 = arith.constant 0 : index
    %c0_2 = arith.constant 0 : index
    %2 = vector.load %arg3[%c0_1, %c0_2] : memref<16x128xbf16, #tpu.memory_space<vmem>>, vector<16x128xbf16>
    %c0_3 = arith.constant 0 : index
    %c0_4 = arith.constant 0 : index
    %3 = vector.load %arg2[%c0_3, %c0_4] : memref<1x512xf32, #tpu.memory_space<vmem>>, vector<1x128xf32>
    %cst = arith.constant dense<0.000000e+00> : vector<8x128xf32>
    %4 = tpu.matmul %1, %2, %cst {dimension_numbers = #tpu.dot_dimension_numbers<[1], [0], [0], [1], [0, 0, 1, 1], [], []>} : vector<8x16xbf16>, vector<16x128xbf16>, vector<8x128xf32> -> vector<8x128xf32>
    %5 = vector.broadcast %3 : vector<1x128xf32> to vector<8x128xf32>
    %6 = arith.addf %4, %5 : vector<8x128xf32>
    %cst_5 = arith.constant 0.000000e+00 : f32
    %7 = vector.broadcast %cst_5 : f32 to vector<8x128xf32>
    %8 = arith.maximumf %6, %7 : vector<8x128xf32>
    %9 = arith.truncf %8 : vector<8x128xf32> to vector<8x128xbf16>
    %c0_6 = arith.constant 0 : index
    %c0_7 = arith.constant 0 : index
    %10 = vector.load %arg4[%c0_6, %c0_7] : memref<128x128xbf16, #tpu.memory_space<vmem>>, vector<128x128xbf16>
    %c0_8 = arith.constant 0 : index
    %c128 = arith.constant 128 : index
    %11 = vector.load %arg2[%c0_8, %c128] : memref<1x512xf32, #tpu.memory_space<vmem>>, vector<1x128xf32>
    %cst_9 = arith.constant dense<0.000000e+00> : vector<8x128xf32>
    %12 = tpu.matmul %9, %10, %cst_9 {dimension_numbers = #tpu.dot_dimension_numbers<[1], [0], [0], [1], [0, 0, 1, 1], [], []>} : vector<8x128xbf16>, vector<128x128xbf16>, vector<8x128xf32> -> vector<8x128xf32>
    %13 = vector.broadcast %11 : vector<1x128xf32> to vector<8x128xf32>
    %14 = arith.addf %12, %13 : vector<8x128xf32>
    %cst_10 = arith.constant 0.000000e+00 : f32
    %15 = vector.broadcast %cst_10 : f32 to vector<8x128xf32>
    %16 = arith.maximumf %14, %15 : vector<8x128xf32>
    %17 = arith.truncf %16 : vector<8x128xf32> to vector<8x128xbf16>
    %c0_11 = arith.constant 0 : index
    %c0_12 = arith.constant 0 : index
    %18 = vector.load %arg5[%c0_11, %c0_12] : memref<128x128xbf16, #tpu.memory_space<vmem>>, vector<128x128xbf16>
    %c0_13 = arith.constant 0 : index
    %c256 = arith.constant 256 : index
    %19 = vector.load %arg2[%c0_13, %c256] : memref<1x512xf32, #tpu.memory_space<vmem>>, vector<1x128xf32>
    %cst_14 = arith.constant dense<0.000000e+00> : vector<8x128xf32>
    %20 = tpu.matmul %17, %18, %cst_14 {dimension_numbers = #tpu.dot_dimension_numbers<[1], [0], [0], [1], [0, 0, 1, 1], [], []>} : vector<8x128xbf16>, vector<128x128xbf16>, vector<8x128xf32> -> vector<8x128xf32>
    %21 = vector.broadcast %19 : vector<1x128xf32> to vector<8x128xf32>
    %22 = arith.addf %20, %21 : vector<8x128xf32>
    %cst_15 = arith.constant 0.000000e+00 : f32
    %23 = vector.broadcast %cst_15 : f32 to vector<8x128xf32>
    %24 = arith.maximumf %22, %23 : vector<8x128xf32>
    %25 = arith.truncf %24 : vector<8x128xf32> to vector<8x128xbf16>
    %c0_16 = arith.constant 0 : index
    %c0_17 = arith.constant 0 : index
    %26 = vector.load %arg6[%c0_16, %c0_17] : memref<128x128xbf16, #tpu.memory_space<vmem>>, vector<128x128xbf16>
    %c0_18 = arith.constant 0 : index
    %c384 = arith.constant 384 : index
    %27 = vector.load %arg2[%c0_18, %c384] : memref<1x512xf32, #tpu.memory_space<vmem>>, vector<1x128xf32>
    %cst_19 = arith.constant dense<0.000000e+00> : vector<8x128xf32>
    %28 = tpu.matmul %25, %26, %cst_19 {dimension_numbers = #tpu.dot_dimension_numbers<[1], [0], [0], [1], [0, 0, 1, 1], [], []>} : vector<8x128xbf16>, vector<128x128xbf16>, vector<8x128xf32> -> vector<8x128xf32>
    %29 = vector.broadcast %27 : vector<1x128xf32> to vector<8x128xf32>
    %30 = arith.addf %28, %29 : vector<8x128xf32>
    %c0_20 = arith.constant 0 : index
    %c0_21 = arith.constant 0 : index
    %31 = vector.load %arg7[%c0_20, %c0_21] : memref<8x128xf32, #tpu.memory_space<vmem>>, vector<8x128xf32>
    tpu.vector_store %arg7[%c0_20, %c0_21], %30 {strides = array<i32>} : memref<8x128xf32, #tpu.memory_space<vmem>>, vector<8x128xf32>,
    return
  }
  func.func @transform_0(%arg0: i32) -> (i32, i32) {
    %c0_i32 = arith.constant 0 : i32
    %c0_i32_0 = arith.constant 0 : i32
    return %arg0, %c0_i32 : i32, i32
  }
  func.func @transform_1(%arg0: i32) -> (i32, i32) {
    %c0_i32 = arith.constant 0 : i32
    %c0_i32_0 = arith.constant 0 : i32
    %c0_i32_1 = arith.constant 0 : i32
    return %c0_i32, %c0_i32_0 : i32, i32
  }
  func.func @transform_2(%arg0: i32) -> (i32, i32) {
    %c0_i32 = arith.constant 0 : i32
    %c0_i32_0 = arith.constant 0 : i32
    %c0_i32_1 = arith.constant 0 : i32
    return %c0_i32, %c0_i32_0 : i32, i32
  }
  func.func @transform_3(%arg0: i32) -> (i32, i32) {
    %c0_i32 = arith.constant 0 : i32
    %c0_i32_0 = arith.constant 0 : i32
    %c0_i32_1 = arith.constant 0 : i32
    return %c0_i32, %c0_i32_0 : i32, i32
  }
  func.func @transform_4(%arg0: i32) -> (i32, i32) {
    %c0_i32 = arith.constant 0 : i32
    %c0_i32_0 = arith.constant 0 : i32
    %c0_i32_1 = arith.constant 0 : i32
    return %c0_i32, %c0_i32_0 : i32, i32
  }
  func.func @transform_5(%arg0: i32) -> (i32, i32) {
    %c0_i32 = arith.constant 0 : i32
    %c0_i32_0 = arith.constant 0 : i32
    %c0_i32_1 = arith.constant 0 : i32
    return %c0_i32, %c0_i32_0 : i32, i32
  }
  func.func @transform_6(%arg0: i32) -> (i32, i32) {
    %c0_i32 = arith.constant 0 : i32
    %c0_i32_0 = arith.constant 0 : i32
    return %arg0, %c0_i32 : i32, i32
  }
}

</mosaic_0001>

<bundles_post_ra>
// kernel: tpu_custom_call.1
= control target key start
LH: loop header
LB: loop body
LE: loop exit
PB: predicated region body
PF: predicated region fallthrough
CT: control target
= control target key end

     0   :  { %11 = vsyncpa [#allocation3], 0  ;;  %s1022_s0 = inlined_call_operand.hbm [shape: f32[8,16], index: 0, kind: input, shape index: {}]   ;;  %s1023_s1 = inlined_call_operand.hbm [shape: f32[1,512], index: 1, kind: input, shape index: {}]   ;;  %s1024_s2 = inlined_call_operand.hbm [shape: bf16[16,128], index: 2, kind: input, shape index: {}]   ;;  %s1025_s3 = inlined_call_operand.hbm [shape: bf16[128,128], index: 3, kind: input, shape index: {}]   ;;  %s1026_s4 = inlined_call_operand.hbm [shape: bf16[128,128], index: 4, kind: input, shape index: {}]   ;;  %s1027_s5 = inlined_call_operand.hbm [shape: bf16[128,128], index: 5, kind: input, shape index: {}]   ;;  %s1028_s6 = inlined_call_operand.hbm [shape: f32[8,128], index: 6, kind: output, shape index: {}]  }
   0x1   :  { %12 = vsyncpa [#allocation6], 0 }
   0x2   :  { %13 = vsyncpa [#allocation9], 0 }
   0x3   :  { %14 = vsyncpa [#allocation12], 0 }
   0x4   :  { %15 = vsyncpa [#allocation4], 0  ;;  %s847_s21 = smov [#allocation5]   ;;  %s683_s25 = scalar_lea.hbm %s1023_s1, 64 }
   0x5   :  { %s32_s22 = sshll.u32 %s847_s21, 4  ;;  %p684_p0 = scmp.ne.s32.totalorder %s1023_s1, %s683_s25  ;;  %s33_s22 = int_to_ptr.vmem [resolvable:$true] %s32_s22 }
   0x6   :  { %p687_p1 = scmp.lt.u32.totalorder %s683_s25, %s1023_s1 }
   0x8   :  { %p689_p2 = pnand %p687_p1, %p684_p0 }
   0xa   :  { %692 = shalt.err (!%p689_p2)
}
   0xb   :  { %s693_s30 = scalar_lea.vmem %s33_s22, 64  ;;  %p698_p4 = scmp.lt.s32.totalorder %s33_s22, %s33_s22 }
   0xc   :  { %p694_p3 = scmp.ne.s32.totalorder %s33_s22, %s693_s30  ;;  %p699_p5 = scmp.lt.s32.totalorder %s693_s30, %s693_s30 }
   0xe   :  { %p700_p6 = por %p699_p5, %p698_p4 }
  0x10   :  { %p701_p7 = pnand %p700_p6, %p694_p3 }
  0x12   :  { %704 = shalt.err (!%p701_p7)
}
  0x13   :  { %35 = dma.hbm_to_vmem [thread:$0]  %s1023_s1, 64, %s33_s22, [#allocation6]  }
  0x14   :  { %s848_s9 = smov [#allocation8]   ;;  %s849_s11 = smov [#allocation2]  }
  0x15   :  { %s53_s10 = sshll.u32 %s848_s9, 4  ;;  %s22_s12 = sshll.u32 %s849_s11, 4  ;;  %s54_s10 = int_to_ptr.vmem [resolvable:$true] %s53_s10  ;;  %s23_s12 = int_to_ptr.vmem [resolvable:$true] %s22_s12 }
  0x16   :  { %s705_s15 = scalar_lea.hbm %s1025_s3, 1024 }
  0x17   :  { %p706_p8 = scmp.ne.s32.totalorder %s1025_s3, %s705_s15  ;;  %p709_p9 = scmp.lt.u32.totalorder %s705_s15, %s1025_s3 }
  0x19   :  { %p711_p10 = pnand %p709_p9, %p706_p8 }
  0x1b   :  { %714 = shalt.err (!%p711_p10)
}
  0x1c   :  { %s715_s1 = scalar_lea.vmem %s54_s10, 1024  ;;  %p720_p12 = scmp.lt.s32.totalorder %s54_s10, %s54_s10 }
  0x1d   :  { %p716_p11 = scmp.ne.s32.totalorder %s54_s10, %s715_s1  ;;  %p721_p13 = scmp.lt.s32.totalorder %s715_s1, %s715_s1 }
  0x1f   :  { %p722_p0 = por %p721_p13, %p720_p12 }
  0x21   :  { %p723_p1 = pnand %p722_p0, %p716_p11 }
  0x23   :  { %726 = shalt.err (!%p723_p1)
}
  0x24   :  { %s850_s20 = smov 64   ;;  %s851_s21 = smov 4  }
  0x25   :  { %59 = dma.hbm_to_vmem [thread:$0]  %s1025_s3, 1024, %s54_s10, [#allocation9], %s850_s20, %s850_s20, %s851_s21  }
  0x26   :  { %s727_s26 = scalar_lea.hbm %s1022_s0, 128 }
  0x27   :  { %p728_p2 = scmp.ne.s32.totalorder %s1022_s0, %s727_s26  ;;  %p731_p3 = scmp.lt.u32.totalorder %s727_s26, %s1022_s0 }
  0x29   :  { %p733_p4 = pnand %p731_p3, %p728_p2 }
  0x2b   :  { %736 = shalt.err (!%p733_p4)
}
  0x2c   :  { %s737_s7 = scalar_lea.vmem %s23_s12, 128  ;;  %p742_p6 = scmp.lt.s32.totalorder %s23_s12, %s23_s12 }
  0x2d   :  { %p738_p5 = scmp.ne.s32.totalorder %s23_s12, %s737_s7  ;;  %p743_p7 = scmp.lt.s32.totalorder %s737_s7, %s737_s7 }
  0x2f   :  { %p744_p8 = por %p743_p7, %p742_p6 }
  0x31   :  { %p745_p9 = pnand %p744_p8, %p738_p5 }
  0x33   :  { %748 = shalt.err (!%p745_p9)
}
  0x34   :  { %25 = dma.hbm_to_vmem [thread:$0]  %s1022_s0, 128, %s23_s12, [#allocation3]  }
  0x35   :  { %s852_s9 = smov [#allocation7]   ;;  %s853_s11 = smov [#allocation10]  }
  0x36   :  { %s41_s10 = sshll.u32 %s852_s9, 4  ;;  %s65_s13 = sshll.u32 %s853_s11, 4  ;;  %s42_s10 = int_to_ptr.vmem [resolvable:$true] %s41_s10  ;;  %s66_s13 = int_to_ptr.vmem [resolvable:$true] %s65_s13 }
  0x37   :  { %s749_s16 = scalar_lea.hbm %s1024_s2, 128 }
  0x38   :  { %p750_p10 = scmp.ne.s32.totalorder %s1024_s2, %s749_s16  ;;  %p753_p11 = scmp.lt.u32.totalorder %s749_s16, %s1024_s2 }
  0x3a   :  { %p755_p12 = pnand %p753_p11, %p750_p10 }
  0x3c   :  { %758 = shalt.err (!%p755_p12)
}
  0x3d   :  { %s759_s0 = scalar_lea.vmem %s42_s10, 128  ;;  %p764_p0 = scmp.lt.s32.totalorder %s42_s10, %s42_s10 }
  0x3e   :  { %p760_p13 = scmp.ne.s32.totalorder %s42_s10, %s759_s0  ;;  %p765_p1 = scmp.lt.s32.totalorder %s759_s0, %s759_s0 }
  0x40   :  { %p766_p2 = por %p765_p1, %p764_p0 }
  0x42   :  { %p767_p3 = pnand %p766_p2, %p760_p13 }
  0x44   :  { %770 = shalt.err (!%p767_p3)
}
  0x45   :  { %47 = dma.hbm_to_vmem [thread:$0]  %s1024_s2, 128, %s42_s10, [#allocation6], %s850_s20, %s850_s20, %s851_s21  }
  0x46   :  { %s771_s25 = scalar_lea.hbm %s1026_s4, 1024 }
  0x47   :  { %p772_p4 = scmp.ne.s32.totalorder %s1026_s4, %s771_s25  ;;  %p775_p5 = scmp.lt.u32.totalorder %s771_s25, %s1026_s4 }
  0x49   :  { %p777_p6 = pnand %p775_p5, %p772_p4 }
  0x4b   :  { %780 = shalt.err (!%p777_p6)
}
  0x4c   :  { %s781_s30 = scalar_lea.vmem %s66_s13, 1024  ;;  %p786_p8 = scmp.lt.s32.totalorder %s66_s13, %s66_s13 }
  0x4d   :  { %p782_p7 = scmp.ne.s32.totalorder %s66_s13, %s781_s30  ;;  %p787_p9 = scmp.lt.s32.totalorder %s781_s30, %s781_s30 }
  0x4f   :  { %p788_p10 = por %p787_p9, %p786_p8 }
  0x51   :  { %p789_p11 = pnand %p788_p10, %p782_p7 }
  0x53   :  { %792 = shalt.err (!%p789_p11)
}
  0x54   :  { %71 = dma.hbm_to_vmem [thread:$0]  %s1026_s4, 1024, %s66_s13, [#allocation9], %s850_s20, %s850_s20, %s851_s21  }
  0x55   :  { %s854_s3 = smov [#allocation11]   ;;  %s793_s11 = scalar_lea.hbm %s1027_s5, 1024 }
  0x56   :  { %s77_s8 = sshll.u32 %s854_s3, 4  ;;  %p794_p12 = scmp.ne.s32.totalorder %s1027_s5, %s793_s11  ;;  %s78_s8 = int_to_ptr.vmem [resolvable:$true] %s77_s8 }
  0x57   :  { %p797_p13 = scmp.lt.u32.totalorder %s793_s11, %s1027_s5 }
  0x59   :  { %p799_p0 = pnand %p797_p13, %p794_p12 }
  0x5b   :  { %802 = shalt.err (!%p799_p0)
}
  0x5c   :  { %s803_s18 = scalar_lea.vmem %s78_s8, 1024  ;;  %p808_p2 = scmp.lt.s32.totalorder %s78_s8, %s78_s8 }
  0x5d   :  { %p804_p1 = scmp.ne.s32.totalorder %s78_s8, %s803_s18  ;;  %p809_p3 = scmp.lt.s32.totalorder %s803_s18, %s803_s18 }
  0x5f   :  { %p810_p4 = por %p809_p3, %p808_p2 }
  0x61   :  { %p811_p5 = pnand %p810_p4, %p804_p1 }
  0x63   :  { %814 = shalt.err (!%p811_p5)
}
  0x64   :  { %83 = dma.hbm_to_vmem [thread:$0]  %s1027_s5, 1024, %s78_s8, [#allocation12], %s850_s20, %s850_s20, %s851_s21  }
  0x65   :  { %837 = dma.done.wait [#allocation3], 128  }
  0x66   :  { %838 = vsyncadd [#allocation3], 4294967168 }
  0x67   :  { %839 = dma.done.wait [#allocation6], 192  }
  0x68   :  { %840 = vsyncadd [#allocation6], 4294967104 }
  0x69   :  { %841 = dma.done.wait [#allocation9], 2048  }
  0x6a   :  { %842 = vsyncadd [#allocation9], 4294965248 }
  0x6b   :  { %843 = dma.done.wait [#allocation12], 1024  }
  0x6c   :  { %844 = vsyncadd [#allocation12], 4294966272  ;;  %v855_v0 = vmov 0.0   ;;  %vm856_vm0 = vmmov 0   ;;  %v658_v1 = vld [vmem:[#allocation7] sm:$0xff]   ;;  %v103_v2 = vld [vmem:[#allocation2] sm:$0xff] }
  0x6d   :  { %581 = vmatprep.subr.bf16.mxu0 %v855_v0  ;;  %583 = vmatprep.mubr.msk.bf16.mxu0 %vm856_vm0, %v855_v0  ;;  %v104_v3 = vpack.c.bf16 %v103_v2, %v103_v2  ;;  %vm120_vm1 = vcmask 130048   ;;  %v659_v4 = vld [vmem:[#allocation8] sm:$0xff]   ;;  %v660_v5 = vld [vmem:[#allocation8 + $0x8] sm:$0xff]   ;;  %v661_v6 = vld [vmem:[#allocation8 + $0x10] sm:$0xff]   ;;  %s857_s5 = smov [#allocation13]  }
  0x6e   :  { %587 = vmatprep.subr.bf16.mxu1 %v855_v0  ;;  %603 = vmatprep.mubr.msk.bf16.mxu1 %vm856_vm0, %v855_v0  ;;  %v662_v7 = vld [vmem:[#allocation8 + $0x18] sm:$0xff]   ;;  %v663_v8 = vld [vmem:[#allocation8 + $0x20] sm:$0xff]   ;;  %v664_v9 = vld [vmem:[#allocation8 + $0x28] sm:$0xff]   ;;  %s510_s20 = sshll.u32 %s857_s5, 4  ;;  %s511_s20 = int_to_ptr.vmem [resolvable:$true] %s510_s20 }
  0x6f   :  { %582 = vmatpush3.bf16.msra.mxu0 %v658_v1  ;;  %588 = vmatpush3.bf16.msra.mxu1 %v659_v4  ;;  %v665_v10 = vld [vmem:[#allocation8 + $0x30] sm:$0xff]   ;;  %v666_v11 = vld [vmem:[#allocation8 + $0x38] sm:$0xff]   ;;  %v667_v12 = vld [vmem:[#allocation10] sm:$0xff]   ;;  %s815_s21 = scalar_lea.vmem %s511_s20, 128  ;;  %p820_p7 = scmp.lt.s32.totalorder %s511_s20, %s511_s20 }
  0x70   :  { %607 = vmatprep.subr.bf16.mxu0 %v855_v0  ;;  %589 = vmatprep.subr.bf16.mxu1 %v855_v0  ;;  %v668_v13 = vld [vmem:[#allocation10 + $0x8] sm:$0xff]   ;;  %v669_v14 = vld [vmem:[#allocation10 + $0x10] sm:$0xff]   ;;  %v670_v15 = vld [vmem:[#allocation10 + $0x18] sm:$0xff]   ;;  %p816_p6 = scmp.ne.s32.totalorder %s511_s20, %s815_s21  ;;  %p821_p8 = scmp.lt.s32.totalorder %s815_s21, %s815_s21 }
  0x71   :  { %v671_v16 = vld [vmem:[#allocation10 + $0x20] sm:$0xff]   ;;  %v672_v17 = vld [vmem:[#allocation10 + $0x28] sm:$0xff]   ;;  %v522_v18 = vld [vmem:[#allocation5] ss:$0 sm:$0xff] }
  0x72   :  { %584 = vmatmul.mubr.msk.bf16.vlgmr.msra.gmra.mrb[0].mxu0 %vm120_vm1, %v104_v3  ;;  %v673_v26 = vld [vmem:[#allocation10 + $0x30] sm:$0xff]   ;;  %v674_v27 = vld [vmem:[#allocation10 + $0x38] sm:$0xff]   ;;  %v675_v28 = vld [vmem:[#allocation11] sm:$0xff]   ;;  %p822_p9 = por %p821_p8, %p820_p7 }
  0x73   :  { %623 = vmatprep.mubr.msk.bf16.mxu0 %vm856_vm0, %v855_v0  ;;  %590 = vmatpush3.bf16.msra.mxu1 %v660_v5  ;;  %v676_v29 = vld [vmem:[#allocation11 + $0x8] sm:$0xff]   ;;  %v677_v30 = vld [vmem:[#allocation11 + $0x10] sm:$0xff]   ;;  %v678_v31 = vld [vmem:[#allocation11 + $0x18] sm:$0xff]  }
  0x74   :  { %591 = vmatprep.subr.bf16.mxu1 %v855_v0  ;;  %608 = vmatpush3.bf16.msra.mxu0 %v667_v12  ;;  %v679_v32 = vld [vmem:[#allocation11 + $0x20] sm:$0xff]   ;;  %v680_v33 = vld [vmem:[#allocation11 + $0x28] sm:$0xff]   ;;  %v525_v34 = vld [vmem:[#allocation5 + $0x1] ss:$0 sm:$0xff]  ;;  %p823_p10 = pnand %p822_p9, %p816_p6 }
  0x75   :  { %609 = vmatprep.subr.bf16.mxu0 %v855_v0  ;;  %v681_v42 = vld [vmem:[#allocation11 + $0x30] sm:$0xff]   ;;  %v682_v43 = vld [vmem:[#allocation11 + $0x38] sm:$0xff]  }
  0x76   :  { %v534_v44 = vld [vmem:[#allocation5 + $0x2] ss:$0 sm:$0xff]  ;;  %v543_v52 = vld [vmem:[#allocation5 + $0x3] ss:$0 sm:$0xff] }
  0x77   :  { %592 = vmatpush3.bf16.msra.mxu1 %v661_v6 }
  0x78   :  { %593 = vmatprep.subr.bf16.mxu1 %v855_v0  ;;  %610 = vmatpush3.bf16.msra.mxu0 %v668_v13 }
  0x79   :  { %611 = vmatprep.subr.bf16.mxu0 %v855_v0 }
  0x7b   :  { %594 = vmatpush3.bf16.msra.mxu1 %v662_v7 }
  0x7c   :  { %595 = vmatprep.subr.bf16.mxu1 %v855_v0  ;;  %612 = vmatpush3.bf16.msra.mxu0 %v669_v14 }
  0x7d   :  { %613 = vmatprep.subr.bf16.mxu0 %v855_v0 }
  0x7f   :  { %596 = vmatpush3.bf16.msra.mxu1 %v663_v8 }
  0x80   :  { %597 = vmatprep.subr.bf16.mxu1 %v855_v0  ;;  %614 = vmatpush3.bf16.msra.mxu0 %v670_v15 }
  0x81   :  { %615 = vmatprep.subr.bf16.mxu0 %v855_v0 }
  0x83   :  { %598 = vmatpush3.bf16.msra.mxu1 %v664_v9 }
  0x84   :  { %599 = vmatprep.subr.bf16.mxu1 %v855_v0  ;;  %616 = vmatpush3.bf16.msra.mxu0 %v671_v16 }
  0x85   :  { %617 = vmatprep.subr.bf16.mxu0 %v855_v0 }
  0x87   :  { %600 = vmatpush3.bf16.msra.mxu1 %v665_v10 }
  0x88   :  { %601 = vmatprep.subr.bf16.mxu1 %v855_v0  ;;  %618 = vmatpush3.bf16.msra.mxu0 %v672_v17 }
  0x89   :  { %619 = vmatprep.subr.bf16.mxu0 %v855_v0 }
  0x8b   :  { %602 = vmatpush3.bf16.msra.mxu1 %v666_v11 }
  0x8c   :  { %627 = vmatprep.subr.bf16.mxu1 %v855_v0  ;;  %620 = vmatpush3.bf16.msra.mxu0 %v673_v26 }
  0x8d   :  { %621 = vmatprep.subr.bf16.mxu0 %v855_v0 }
  0x90   :  { %622 = vmatpush3.bf16.msra.mxu0 %v674_v27 }
 0x145   :  { %v158_v19 = vpop.f32.mrb[0].mxu0 }
 0x146   :  { %v159_v20 = vadd.f32 %v522_v18, %v158_v19  ;;  %v585_v21 = vpop.f32.mrb[1].mxu0 }
 0x147   :  { %v161_v22 = vpop.f32.mrb[2].mxu0 }
 0x148   :  { %v164_v23 = vmax.f32 %v159_v20, 0.0  ;;  %v586_v24 = vpop.f32.mrb[3].mxu0 }
 0x14a   :  { %v165_v25 = vpack.c.bf16 %v164_v23, %v164_v23 }
 0x14c   :  { %604 = vmatmul.mubr.bf16.vlgmr.msra.gmra.mrb[0].mxu1 %v165_v25 }
 0x14d   :  { %643 = vmatprep.mubr.msk.bf16.mxu1 %vm856_vm0, %v855_v0  ;;  %628 = vmatpush3.bf16.msra.mxu1 %v675_v28 }
 0x14e   :  { %629 = vmatprep.subr.bf16.mxu1 %v855_v0 }
 0x151   :  { %630 = vmatpush3.bf16.msra.mxu1 %v676_v29 }
 0x152   :  { %631 = vmatprep.subr.bf16.mxu1 %v855_v0 }
 0x155   :  { %632 = vmatpush3.bf16.msra.mxu1 %v677_v30 }
 0x156   :  { %633 = vmatprep.subr.bf16.mxu1 %v855_v0 }
 0x159   :  { %634 = vmatpush3.bf16.msra.mxu1 %v678_v31 }
 0x15a   :  { %635 = vmatprep.subr.bf16.mxu1 %v855_v0 }
 0x15d   :  { %636 = vmatpush3.bf16.msra.mxu1 %v679_v32 }
 0x15e   :  { %637 = vmatprep.subr.bf16.mxu1 %v855_v0 }
 0x161   :  { %638 = vmatpush3.bf16.msra.mxu1 %v680_v33 }
 0x162   :  { %639 = vmatprep.subr.bf16.mxu1 %v855_v0 }
 0x165   :  { %640 = vmatpush3.bf16.msra.mxu1 %v681_v42 }
 0x166   :  { %641 = vmatprep.subr.bf16.mxu1 %v855_v0 }
 0x169   :  { %642 = vmatpush3.bf16.msra.mxu1 %v682_v43 }
 0x21f   :  { %v271_v35 = vpop.f32.mrb[0].mxu1 }
 0x220   :  { %v272_v36 = vadd.f32 %v525_v34, %v271_v35  ;;  %v605_v37 = vpop.f32.mrb[1].mxu1 }
 0x221   :  { %v274_v38 = vpop.f32.mrb[2].mxu1 }
 0x222   :  { %v277_v39 = vmax.f32 %v272_v36, 0.0  ;;  %v606_v40 = vpop.f32.mrb[3].mxu1 }
 0x224   :  { %v278_v41 = vpack.c.bf16 %v277_v39, %v277_v39 }
 0x226   :  { %624 = vmatmul.mubr.bf16.vlgmr.msra.gmra.mrb[4].mxu0 %v278_v41 }
 0x2f9   :  { %v384_v45 = vpop.f32.mrb[4].mxu0 }
 0x2fa   :  { %v385_v46 = vadd.f32 %v534_v44, %v384_v45  ;;  %v625_v47 = vpop.f32.mrb[5].mxu0 }
 0x2fb   :  { %v387_v48 = vpop.f32.mrb[6].mxu0 }
 0x2fc   :  { %v390_v49 = vmax.f32 %v385_v46, 0.0  ;;  %v626_v50 = vpop.f32.mrb[7].mxu0 }
 0x2fe   :  { %v391_v51 = vpack.c.bf16 %v390_v49, %v390_v49 }
 0x300   :  { %644 = vmatmul.mubr.bf16.vlgmr.msra.gmra.mrb[4].mxu1 %v391_v51 }
 0x3d3   :  { %v497_v53 = vpop.f32.mrb[4].mxu1 }
 0x3d4   :  { %v498_v54 = vadd.f32 %v543_v52, %v497_v53  ;;  %v645_v55 = vpop.f32.mrb[5].mxu1 }
 0x3d5   :  { %v500_v56 = vpop.f32.mrb[6].mxu1 }
 0x3d6   :  { %503 = vst [vmem:[#allocation13] sm:$0xff] %v498_v54  ;;  %v646_v57 = vpop.f32.mrb[7].mxu1 }
 0x3d7   :  { %826 = shalt.err (!%p823_p10)
}
 0x3d8   :  { %s827_s0 = scalar_lea.hbm %s1028_s6, 128 }
 0x3d9   :  { %p828_p11 = scmp.ne.s32.totalorder %s1028_s6, %s827_s0  ;;  %p831_p12 = scmp.lt.u32.totalorder %s827_s0, %s1028_s6 }
 0x3db   :  { %p833_p13 = pnand %p831_p12, %p828_p11 }
 0x3dd   :  { %836 = shalt.err (!%p833_p13)
}
 0x3de   :  { %513 = dma.vmem_to_hbm [thread:$0]  %s511_s20, 128, %s1028_s6, [#allocation4]  }
 0x3df   :  { %845 = dma.done.wait [#allocation4], 128  }
 0x3e0   :  { %846 = vsyncadd [#allocation4], 4294967168 }
 0x3e1   :  { %517 = vsyncpa [#allocation3], 1 }
 0x3e2   :  { %518 = vsyncpa [#allocation6], 1 }
 0x3e3   :  { %519 = vsyncpa [#allocation9], 1 }
 0x3e4   :  { %520 = vsyncpa [#allocation12], 1 }
 0x3e5   :  { %521 = vsyncpa [#allocation4], 1 }

// kernel: tpu_custom_call.1
= control target key start
LH: loop header
LB: loop body
LE: loop exit
PB: predicated region body
PF: predicated region fallthrough
CT: control target
= control target key end

     0   :  { %11 = vsyncpa [#allocation3], 0  ;;  %s1022_s0 = inlined_call_operand.hbm [shape: f32[8,16], index: 0, kind: input, shape index: {}]   ;;  %s1023_s1 = inlined_call_operand.hbm [shape: f32[1,512], index: 1, kind: input, shape index: {}]   ;;  %s1024_s2 = inlined_call_operand.hbm [shape: bf16[16,128], index: 2, kind: input, shape index: {}]   ;;  %s1025_s3 = inlined_call_operand.hbm [shape: bf16[128,128], index: 3, kind: input, shape index: {}]   ;;  %s1026_s4 = inlined_call_operand.hbm [shape: bf16[128,128], index: 4, kind: input, shape index: {}]   ;;  %s1027_s5 = inlined_call_operand.hbm [shape: bf16[128,128], index: 5, kind: input, shape index: {}]   ;;  %s1028_s6 = inlined_call_operand.hbm [shape: f32[8,128], index: 6, kind: output, shape index: {}]  }
   0x1   :  { %12 = vsyncpa [#allocation6], 0 }
   0x2   :  { %13 = vsyncpa [#allocation9], 0 }
   0x3   :  { %14 = vsyncpa [#allocation12], 0 }
   0x4   :  { %15 = vsyncpa [#allocation4], 0  ;;  %s847_s21 = smov [#allocation5]   ;;  %s683_s25 = scalar_lea.hbm %s1023_s1, 64 }
   0x5   :  { %s32_s22 = sshll.u32 %s847_s21, 4  ;;  %p684_p0 = scmp.ne.s32.totalorder %s1023_s1, %s683_s25  ;;  %s33_s22 = int_to_ptr.vmem [resolvable:$true] %s32_s22 }
   0x6   :  { %p687_p1 = scmp.lt.u32.totalorder %s683_s25, %s1023_s1 }
   0x8   :  { %p689_p2 = pnand %p687_p1, %p684_p0 }
   0xa   :  { %692 = shalt.err (!%p689_p2)
}
   0xb   :  { %s693_s30 = scalar_lea.vmem %s33_s22, 64  ;;  %p698_p4 = scmp.lt.s32.totalorder %s33_s22, %s33_s22 }
   0xc   :  { %p694_p3 = scmp.ne.s32.totalorder %s33_s22, %s693_s30  ;;  %p699_p5 = scmp.lt.s32.totalorder %s693_s30, %s693_s30 }
   0xe   :  { %p700_p6 = por %p699_p5, %p698_p4 }
  0x10   :  { %p701_p7 = pnand %p700_p6, %p694_p3 }
  0x12   :  { %704 = shalt.err (!%p701_p7)
}
  0x13   :  { %35 = dma.hbm_to_vmem [thread:$0]  %s1023_s1, 64, %s33_s22, [#allocation6]  }
  0x14   :  { %s848_s9 = smov [#allocation8]   ;;  %s849_s11 = smov [#allocation2]  }
  0x15   :  { %s53_s10 = sshll.u32 %s848_s9, 4  ;;  %s22_s12 = sshll.u32 %s849_s11, 4  ;;  %s54_s10 = int_to_ptr.vmem [resolvable:$true] %s53_s10  ;;  %s23_s12 = int_to_ptr.vmem [resolvable:$true] %s22_s12 }
  0x16   :  { %s705_s15 = scalar_lea.hbm %s1025_s3, 1024 }
  0x17   :  { %p706_p8 = scmp.ne.s32.totalorder %s1025_s3, %s705_s15  ;;  %p709_p9 = scmp.lt.u32.totalorder %s705_s15, %s1025_s3 }
  0x19   :  { %p711_p10 = pnand %p709_p9, %p706_p8 }
  0x1b   :  { %714 = shalt.err (!%p711_p10)
}
  0x1c   :  { %s715_s1 = scalar_lea.vmem %s54_s10, 1024  ;;  %p720_p12 = scmp.lt.s32.totalorder %s54_s10, %s54_s10 }
  0x1d   :  { %p716_p11 = scmp.ne.s32.totalorder %s54_s10, %s715_s1  ;;  %p721_p13 = scmp.lt.s32.totalorder %s715_s1, %s715_s1 }
  0x1f   :  { %p722_p0 = por %p721_p13, %p720_p12 }
  0x21   :  { %p723_p1 = pnand %p722_p0, %p716_p11 }
  0x23   :  { %726 = shalt.err (!%p723_p1)
}
  0x24   :  { %s850_s20 = smov 64   ;;  %s851_s21 = smov 4  }
  0x25   :  { %59 = dma.hbm_to_vmem [thread:$0]  %s1025_s3, 1024, %s54_s10, [#allocation9], %s850_s20, %s850_s20, %s851_s21  }
  0x26   :  { %s727_s26 = scalar_lea.hbm %s1022_s0, 128 }
  0x27   :  { %p728_p2 = scmp.ne.s32.totalorder %s1022_s0, %s727_s26  ;;  %p731_p3 = scmp.lt.u32.totalorder %s727_s26, %s1022_s0 }
  0x29   :  { %p733_p4 = pnand %p731_p3, %p728_p2 }
  0x2b   :  { %736 = shalt.err (!%p733_p4)
}
  0x2c   :  { %s737_s7 = scalar_lea.vmem %s23_s12, 128  ;;  %p742_p6 = scmp.lt.s32.totalorder %s23_s12, %s23_s12 }
  0x2d   :  { %p738_p5 = scmp.ne.s32.totalorder %s23_s12, %s737_s7  ;;  %p743_p7 = scmp.lt.s32.totalorder %s737_s7, %s737_s7 }
  0x2f   :  { %p744_p8 = por %p743_p7, %p742_p6 }
  0x31   :  { %p745_p9 = pnand %p744_p8, %p738_p5 }
  0x33   :  { %748 = shalt.err (!%p745_p9)
}
  0x34   :  { %25 = dma.hbm_to_vmem [thread:$0]  %s1022_s0, 128, %s23_s12, [#allocation3]  }
  0x35   :  { %s852_s9 = smov [#allocation7]   ;;  %s853_s11 = smov [#allocation10]  }
  0x36   :  { %s41_s10 = sshll.u32 %s852_s9, 4  ;;  %s65_s13 = sshll.u32 %s853_s11, 4  ;;  %s42_s10 = int_to_ptr.vmem [resolvable:$true] %s41_s10  ;;  %s66_s13 = int_to_ptr.vmem [resolvable:$true] %s65_s13 }
  0x37   :  { %s749_s16 = scalar_lea.hbm %s1024_s2, 128 }
  0x38   :  { %p750_p10 = scmp.ne.s32.totalorder %s1024_s2, %s749_s16  ;;  %p753_p11 = scmp.lt.u32.totalorder %s749_s16, %s1024_s2 }
  0x3a   :  { %p755_p12 = pnand %p753_p11, %p750_p10 }
  0x3c   :  { %758 = shalt.err (!%p755_p12)
}
  0x3d   :  { %s759_s0 = scalar_lea.vmem %s42_s10, 128  ;;  %p764_p0 = scmp.lt.s32.totalorder %s42_s10, %s42_s10 }
  0x3e   :  { %p760_p13 = scmp.ne.s32.totalorder %s42_s10, %s759_s0  ;;  %p765_p1 = scmp.lt.s32.totalorder %s759_s0, %s759_s0 }
  0x40   :  { %p766_p2 = por %p765_p1, %p764_p0 }
  0x42   :  { %p767_p3 = pnand %p766_p2, %p760_p13 }
  0x44   :  { %770 = shalt.err (!%p767_p3)
}
  0x45   :  { %47 = dma.hbm_to_vmem [thread:$0]  %s1024_s2, 128, %s42_s10, [#allocation6], %s850_s20, %s850_s20, %s851_s21  }
  0x46   :  { %s771_s25 = scalar_lea.hbm %s1026_s4, 1024 }
  0x47   :  { %p772_p4 = scmp.ne.s32.totalorder %s1026_s4, %s771_s25  ;;  %p775_p5 = scmp.lt.u32.totalorder %s771_s25, %s1026_s4 }
  0x49   :  { %p777_p6 = pnand %p775_p5, %p772_p4 }
  0x4b   :  { %780 = shalt.err (!%p777_p6)
}
  0x4c   :  { %s781_s30 = scalar_lea.vmem %s66_s13, 1024  ;;  %p786_p8 = scmp.lt.s32.totalorder %s66_s13, %s66_s13 }
  0x4d   :  { %p782_p7 = scmp.ne.s32.totalorder %s66_s13, %s781_s30  ;;  %p787_p9 = scmp.lt.s32.totalorder %s781_s30, %s781_s30 }
  0x4f   :  { %p788_p10 = por %p787_p9, %p786_p8 }
  0x51   :  { %p789_p11 = pnand %p788_p10, %p782_p7 }
  0x53   :  { %792 = shalt.err (!%p789_p11)
}
  0x54   :  { %71 = dma.hbm_to_vmem [thread:$0]  %s1026_s4, 1024, %s66_s13, [#allocation9], %s850_s20, %s850_s20, %s851_s21  }
  0x55   :  { %s854_s3 = smov [#allocation11]   ;;  %s793_s11 = scalar_lea.hbm %s1027_s5, 1024 }
  0x56   :  { %s77_s8 = sshll.u32 %s854_s3, 4  ;;  %p794_p12 = scmp.ne.s32.totalorder %s1027_s5, %s793_s11  ;;  %s78_s8 = int_to_ptr.vmem [resolvable:$true] %s77_s8 }
  0x57   :  { %p797_p13 = scmp.lt.u32.totalorder %s793_s11, %s1027_s5 }
  0x59   :  { %p799_p0 = pnand %p797_p13, %p794_p12 }
  0x5b   :  { %802 = shalt.err (!%p799_p0)
}
  0x5c   :  { %s803_s18 = scalar_lea.vmem %s78_s8, 1024  ;;  %p808_p2 = scmp.lt.s32.totalorder %s78_s8, %s78_s8 }
  0x5d   :  { %p804_p1 = scmp.ne.s32.totalorder %s78_s8, %s803_s18  ;;  %p809_p3 = scmp.lt.s32.totalorder %s803_s18, %s803_s18 }
  0x5f   :  { %p810_p4 = por %p809_p3, %p808_p2 }
  0x61   :  { %p811_p5 = pnand %p810_p4, %p804_p1 }
  0x63   :  { %814 = shalt.err (!%p811_p5)
}
  0x64   :  { %83 = dma.hbm_to_vmem [thread:$0]  %s1027_s5, 1024, %s78_s8, [#allocation12], %s850_s20, %s850_s20, %s851_s21  }
  0x65   :  { %837 = dma.done.wait [#allocation3], 128  }
  0x66   :  { %838 = vsyncadd [#allocation3], 4294967168 }
  0x67   :  { %839 = dma.done.wait [#allocation6], 192  }
  0x68   :  { %840 = vsyncadd [#allocation6], 4294967104 }
  0x69   :  { %841 = dma.done.wait [#allocation9], 2048  }
  0x6a   :  { %842 = vsyncadd [#allocation9], 4294965248 }
  0x6b   :  { %843 = dma.done.wait [#allocation12], 1024  }
  0x6c   :  { %844 = vsyncadd [#allocation12], 4294966272  ;;  %v855_v0 = vmov 0.0   ;;  %vm856_vm0 = vmmov 0   ;;  %v658_v1 = vld [vmem:[#allocation7] sm:$0xff]   ;;  %v103_v2 = vld [vmem:[#allocation2] sm:$0xff] }
  0x6d   :  { %581 = vmatprep.subr.bf16.mxu0 %v855_v0  ;;  %583 = vmatprep.mubr.msk.bf16.mxu0 %vm856_vm0, %v855_v0  ;;  %v104_v3 = vpack.c.bf16 %v103_v2, %v103_v2  ;;  %vm120_vm1 = vcmask 130048   ;;  %v659_v4 = vld [vmem:[#allocation8] sm:$0xff]   ;;  %v660_v5 = vld [vmem:[#allocation8 + $0x8] sm:$0xff]   ;;  %v661_v6 = vld [vmem:[#allocation8 + $0x10] sm:$0xff]   ;;  %s857_s5 = smov [#allocation13]  }
  0x6e   :  { %587 = vmatprep.subr.bf16.mxu1 %v855_v0  ;;  %603 = vmatprep.mubr.msk.bf16.mxu1 %vm856_vm0, %v855_v0  ;;  %v662_v7 = vld [vmem:[#allocation8 + $0x18] sm:$0xff]   ;;  %v663_v8 = vld [vmem:[#allocation8 + $0x20] sm:$0xff]   ;;  %v664_v9 = vld [vmem:[#allocation8 + $0x28] sm:$0xff]   ;;  %s510_s20 = sshll.u32 %s857_s5, 4  ;;  %s511_s20 = int_to_ptr.vmem [resolvable:$true] %s510_s20 }
  0x6f   :  { %582 = vmatpush3.bf16.msra.mxu0 %v658_v1  ;;  %588 = vmatpush3.bf16.msra.mxu1 %v659_v4  ;;  %v665_v10 = vld [vmem:[#allocation8 + $0x30] sm:$0xff]   ;;  %v666_v11 = vld [vmem:[#allocation8 + $0x38] sm:$0xff]   ;;  %v667_v12 = vld [vmem:[#allocation10] sm:$0xff]   ;;  %s815_s21 = scalar_lea.vmem %s511_s20, 128  ;;  %p820_p7 = scmp.lt.s32.totalorder %s511_s20, %s511_s20 }
  0x70   :  { %607 = vmatprep.subr.bf16.mxu0 %v855_v0  ;;  %589 = vmatprep.subr.bf16.mxu1 %v855_v0  ;;  %v668_v13 = vld [vmem:[#allocation10 + $0x8] sm:$0xff]   ;;  %v669_v14 = vld [vmem:[#allocation10 + $0x10] sm:$0xff]   ;;  %v670_v15 = vld [vmem:[#allocation10 + $0x18] sm:$0xff]   ;;  %p816_p6 = scmp.ne.s32.totalorder %s511_s20, %s815_s21  ;;  %p821_p8 = scmp.lt.s32.totalorder %s815_s21, %s815_s21 }
  0x71   :  { %v671_v16 = vld [vmem:[#allocation10 + $0x20] sm:$0xff]   ;;  %v672_v17 = vld [vmem:[#allocation10 + $0x28] sm:$0xff]   ;;  %v522_v18 = vld [vmem:[#allocation5] ss:$0 sm:$0xff] }
  0x72   :  { %584 = vmatmul.mubr.msk.bf16.vlgmr.msra.gmra.mrb[0].mxu0 %vm120_vm1, %v104_v3  ;;  %v673_v26 = vld [vmem:[#allocation10 + $0x30] sm:$0xff]   ;;  %v674_v27 = vld [vmem:[#allocation10 + $0x38] sm:$0xff]   ;;  %v675_v28 = vld [vmem:[#allocation11] sm:$0xff]   ;;  %p822_p9 = por %p821_p8, %p820_p7 }
  0x73   :  { %623 = vmatprep.mubr.msk.bf16.mxu0 %vm856_vm0, %v855_v0  ;;  %590 = vmatpush3.bf16.msra.mxu1 %v660_v5  ;;  %v676_v29 = vld [vmem:[#allocation11 + $0x8] sm:$0xff]   ;;  %v677_v30 = vld [vmem:[#allocation11 + $0x10] sm:$0xff]   ;;  %v678_v31 = vld [vmem:[#allocation11 + $0x18] sm:$0xff]  }
  0x74   :  { %591 = vmatprep.subr.bf16.mxu1 %v855_v0  ;;  %608 = vmatpush3.bf16.msra.mxu0 %v667_v12  ;;  %v679_v32 = vld [vmem:[#allocation11 + $0x20] sm:$0xff]   ;;  %v680_v33 = vld [vmem:[#allocation11 + $0x28] sm:$0xff]   ;;  %v525_v34 = vld [vmem:[#allocation5 + $0x1] ss:$0 sm:$0xff]  ;;  %p823_p10 = pnand %p822_p9, %p816_p6 }
  0x75   :  { %609 = vmatprep.subr.bf16.mxu0 %v855_v0  ;;  %v681_v42 = vld [vmem:[#allocation11 + $0x30] sm:$0xff]   ;;  %v682_v43 = vld [vmem:[#allocation11 + $0x38] sm:$0xff]  }
  0x76   :  { %v534_v44 = vld [vmem:[#allocation5 + $0x2] ss:$0 sm:$0xff]  ;;  %v543_v52 = vld [vmem:[#allocation5 + $0x3] ss:$0 sm:$0xff] }
  0x77   :  { %592 = vmatpush3.bf16.msra.mxu1 %v661_v6 }
  0x78   :  { %593 = vmatprep.subr.bf16.mxu1 %v855_v0  ;;  %610 = vmatpush3.bf16.msra.mxu0 %v668_v13 }
  0x79   :  { %611 = vmatprep.subr.bf16.mxu0 %v855_v0 }
  0x7b   :  { %594 = vmatpush3.bf16.msra.mxu1 %v662_v7 }
  0x7c   :  { %595 = vmatprep.subr.bf16.mxu1 %v855_v0  ;;  %612 = vmatpush3.bf16.msra.mxu0 %v669_v14 }
  0x7d   :  { %613 = vmatprep.subr.bf16.mxu0 %v855_v0 }
  0x7f   :  { %596 = vmatpush3.bf16.msra.mxu1 %v663_v8 }
  0x80   :  { %597 = vmatprep.subr.bf16.mxu1 %v855_v0  ;;  %614 = vmatpush3.bf16.msra.mxu0 %v670_v15 }
  0x81   :  { %615 = vmatprep.subr.bf16.mxu0 %v855_v0 }
  0x83   :  { %598 = vmatpush3.bf16.msra.mxu1 %v664_v9 }
  0x84   :  { %599 = vmatprep.subr.bf16.mxu1 %v855_v0  ;;  %616 = vmatpush3.bf16.msra.mxu0 %v671_v16 }
  0x85   :  { %617 = vmatprep.subr.bf16.mxu0 %v855_v0 }
  0x87   :  { %600 = vmatpush3.bf16.msra.mxu1 %v665_v10 }
  0x88   :  { %601 = vmatprep.subr.bf16.mxu1 %v855_v0  ;;  %618 = vmatpush3.bf16.msra.mxu0 %v672_v17 }
  0x89   :  { %619 = vmatprep.subr.bf16.mxu0 %v855_v0 }
  0x8b   :  { %602 = vmatpush3.bf16.msra.mxu1 %v666_v11 }
  0x8c   :  { %627 = vmatprep.subr.bf16.mxu1 %v855_v0  ;;  %620 = vmatpush3.bf16.msra.mxu0 %v673_v26 }
  0x8d   :  { %621 = vmatprep.subr.bf16.mxu0 %v855_v0 }
  0x90   :  { %622 = vmatpush3.bf16.msra.mxu0 %v674_v27 }
 0x145   :  { %v158_v19 = vpop.f32.mrb[0].mxu0 }
 0x146   :  { %v159_v20 = vadd.f32 %v522_v18, %v158_v19  ;;  %v585_v21 = vpop.f32.mrb[1].mxu0 }
 0x147   :  { %v161_v22 = vpop.f32.mrb[2].mxu0 }
 0x148   :  { %v164_v23 = vmax.f32 %v159_v20, 0.0  ;;  %v586_v24 = vpop.f32.mrb[3].mxu0 }
 0x14a   :  { %v165_v25 = vpack.c.bf16 %v164_v23, %v164_v23 }
 0x14c   :  { %604 = vmatmul.mubr.bf16.vlgmr.msra.gmra.mrb[0].mxu1 %v165_v25 }
 0x14d   :  { %643 = vmatprep.mubr.msk.bf16.mxu1 %vm856_vm0, %v855_v0  ;;  %628 = vmatpush3.bf16.msra.mxu1 %v675_v28 }
 0x14e   :  { %629 = vmatprep.subr.bf16.mxu1 %v855_v0 }
 0x151   :  { %630 = vmatpush3.bf16.msra.mxu1 %v676_v29 }
 0x152   :  { %631 = vmatprep.subr.bf16.mxu1 %v855_v0 }
 0x155   :  { %632 = vmatpush3.bf16.msra.mxu1 %v677_v30 }
 0x156   :  { %633 = vmatprep.subr.bf16.mxu1 %v855_v0 }
 0x159   :  { %634 = vmatpush3.bf16.msra.mxu1 %v678_v31 }
 0x15a   :  { %635 = vmatprep.subr.bf16.mxu1 %v855_v0 }
 0x15d   :  { %636 = vmatpush3.bf16.msra.mxu1 %v679_v32 }
 0x15e   :  { %637 = vmatprep.subr.bf16.mxu1 %v855_v0 }
 0x161   :  { %638 = vmatpush3.bf16.msra.mxu1 %v680_v33 }
 0x162   :  { %639 = vmatprep.subr.bf16.mxu1 %v855_v0 }
 0x165   :  { %640 = vmatpush3.bf16.msra.mxu1 %v681_v42 }
 0x166   :  { %641 = vmatprep.subr.bf16.mxu1 %v855_v0 }
 0x169   :  { %642 = vmatpush3.bf16.msra.mxu1 %v682_v43 }
 0x21f   :  { %v271_v35 = vpop.f32.mrb[0].mxu1 }
 0x220   :  { %v272_v36 = vadd.f32 %v525_v34, %v271_v35  ;;  %v605_v37 = vpop.f32.mrb[1].mxu1 }
 0x221   :  { %v274_v38 = vpop.f32.mrb[2].mxu1 }
 0x222   :  { %v277_v39 = vmax.f32 %v272_v36, 0.0  ;;  %v606_v40 = vpop.f32.mrb[3].mxu1 }
 0x224   :  { %v278_v41 = vpack.c.bf16 %v277_v39, %v277_v39 }
 0x226   :  { %624 = vmatmul.mubr.bf16.vlgmr.msra.gmra.mrb[4].mxu0 %v278_v41 }
 0x2f9   :  { %v384_v45 = vpop.f32.mrb[4].mxu0 }
 0x2fa   :  { %v385_v46 = vadd.f32 %v534_v44, %v384_v45  ;;  %v625_v47 = vpop.f32.mrb[5].mxu0 }
 0x2fb   :  { %v387_v48 = vpop.f32.mrb[6].mxu0 }
 0x2fc   :  { %v390_v49 = vmax.f32 %v385_v46, 0.0  ;;  %v626_v50 = vpop.f32.mrb[7].mxu0 }
 0x2fe   :  { %v391_v51 = vpack.c.bf16 %v390_v49, %v390_v49 }
 0x300   :  { %644 = vmatmul.mubr.bf16.vlgmr.msra.gmra.mrb[4].mxu1 %v391_v51 }
 0x3d3   :  { %v497_v53 = vpop.f32.mrb[4].mxu1 }
 0x3d4   :  { %v498_v54 = vadd.f32 %v543_v52, %v497_v53  ;;  %v645_v55 = vpop.f32.mrb[5].mxu1 }
 0x3d5   :  { %v500_v56 = vpop.f32.mrb[6].mxu1 }
 0x3d6   :  { %503 = vst [vmem:[#allocation13] sm:$0xff] %v498_v54  ;;  %v646_v57 = vpop.f32.mrb[7].mxu1 }
 0x3d7   :  { %826 = shalt.err (!%p823_p10)
}
 0x3d8   :  { %s827_s0 = scalar_lea.hbm %s1028_s6, 128 }
 0x3d9   :  { %p828_p11 = scmp.ne.s32.totalorder %s1028_s6, %s827_s0  ;;  %p831_p12 = scmp.lt.u32.totalorder %s827_s0, %s1028_s6 }
 0x3db   :  { %p833_p13 = pnand %p831_p12, %p828_p11 }
 0x3dd   :  { %836 = shalt.err (!%p833_p13)
}
 0x3de   :  { %513 = dma.vmem_to_hbm [thread:$0]  %s511_s20, 128, %s1028_s6, [#allocation4]  }
 0x3df   :  { %845 = dma.done.wait [#allocation4], 128  }
 0x3e0   :  { %846 = vsyncadd [#allocation4], 4294967168 }
 0x3e1   :  { %517 = vsyncpa [#allocation3], 1 }
 0x3e2   :  { %518 = vsyncpa [#allocation6], 1 }
 0x3e3   :  { %519 = vsyncpa [#allocation9], 1 }
 0x3e4   :  { %520 = vsyncpa [#allocation12], 1 }
 0x3e5   :  { %521 = vsyncpa [#allocation4], 1 }

</bundles_post_ra>
